<compile_context>
chip_gen: v6e
topology: v6e:2x2x1
jax: 0.10.0
libtpu: 0.0.40
codegen_flags: <defaults>
</compile_context>

<pallas_src>
import jax
import jax.numpy as jnp
from jax.experimental import pallas as pl
from jax.experimental.pallas import tpu as pltpu


def _round_up(n, m):
    return ((n + m - 1) // m) * m


def _cdiv(a, b):
    return (a + b - 1) // b


def _qnet_kernel(x_ref, w_ref, b_ref, o_ref):
    # One MXU matmul per batch tile (f32 accumulation) + lane-broadcast bias
    # add on the VPU.  astype is a no-op for the default f32 output.
    o_ref[...] = (
        jnp.dot(x_ref[...], w_ref[...], preferred_element_type=jnp.float32)
        + b_ref[...]
    ).astype(o_ref.dtype)


def make_qnet_params(w, b, *, use_bf16=False, pad_out_to_lanes=False):
    """Repack PyTorch-layout Linear params once, at init time.

    w: (D, H) PyTorch layout, b: (D,).
    Returns (w_t, b2d): w_t (H, Dk) ready for x @ w_t, b2d (1, Dk) f32.
    Dk is D (compact, default) or D rounded up to 128 (pad_out_to_lanes).
    """
    D, H = w.shape
    assert b.shape == (D,)
    Dk = _round_up(D, 128) if pad_out_to_lanes else D
    w_t = jnp.zeros((H, Dk), w.dtype).at[:, :D].set(w.T)
    b2d = jnp.zeros((1, Dk), jnp.float32).at[:, :D].set(b.astype(jnp.float32))
    if use_bf16:
        w_t = w_t.astype(jnp.bfloat16)
    return w_t, b2d


def qnet_forward(x, w_t, b2d, *, dout=None, block_b=1024,
                 out_dtype=jnp.float32, use_bf16=False):
    """q = x @ w_t + b2d  (PyTorch nn.Linear semantics on repacked params).

    x: (B, H); w_t: (H, Dk); b2d: (1, Dk).  Returns (B, dout) out_dtype.
    """
    B, H = x.shape
    H_w, Dk = w_t.shape
    assert H == H_w and b2d.shape == (1, Dk)
    dout = Dk if dout is None else dout

    # Balanced batch tiles: minimize padding while amortizing grid-step
    # overhead; keep >=2 tiles on big batches so both v7x TCs get work.
    n_tiles = max(_cdiv(B, block_b), 1)
    if B >= 1024 and n_tiles < 2:
        n_tiles = 2
    TB = _round_up(_cdiv(B, n_tiles), 8)  # f32/bf16 sublane-aligned
    Bp = n_tiles * TB

    xp = x
    if use_bf16:
        # NOTE: prefer casting in the producer (keep x bf16 end-to-end);
        # this wrapper-side cast is a separate XLA pass over x.
        xp = xp.astype(jnp.bfloat16)
    if Bp != B:
        xp = jnp.pad(xp, ((0, Bp - B), (0, 0)))

    q = pl.pallas_call(
        _qnet_kernel,
        out_shape=jax.ShapeDtypeStruct((Bp, Dk), out_dtype),
        grid=(n_tiles,),
        in_specs=[
            pl.BlockSpec((TB, H), lambda i: (i, 0)),    # streamed batch tile
            pl.BlockSpec((H, Dk), lambda i: (0, 0)),    # resident weight
            pl.BlockSpec((1, Dk), lambda i: (0, 0)),    # resident bias
        ],
        out_specs=pl.BlockSpec((TB, Dk), lambda i: (i, 0)),
        compiler_params=pltpu.CompilerParams(
            dimension_semantics=("parallel",),  # shard batch tiles across TCs
        ),
    )(xp, w_t, b2d)

    # Remove batch padding / lane padding (no-ops on the default compact path
    # with an exactly-tiled batch).
    if Bp != B:
        q = q[:B]
    if dout != Dk:
        q = q[:, :dout]
    return q


if __name__ == "__main__":
    HIDDEN, DOUT = 32, 16

    key = jax.random.PRNGKey(0)
    kx, kw, kb, kx2 = jax.random.split(key, 4)

    # Deterministic parameter init (mimics PyTorch Linear uniform init range).
    bound = 1.0 / jnp.sqrt(jnp.float32(HIDDEN))
    w = jax.random.uniform(kw, (DOUT, HIDDEN), jnp.float32, -bound, bound)
    b = jax.random.uniform(kb, (DOUT,), jnp.float32, -bound, bound)

    # Params repacked ONCE (hoisted out of the per-call path).
    w_t, b2d = make_qnet_params(w, b)

    # Case 1: small batch consistent with the module (single tile, no pad).
    B1 = 8
    x1 = jax.random.normal(kx, (B1, HIDDEN), jnp.float32)
    q1 = jax.block_until_ready(qnet_forward(x1, w_t, b2d, dout=DOUT))
    ref1 = x1 @ w.T + b
    assert q1.shape == (B1, DOUT)
    assert jnp.allclose(q1, ref1, atol=1e-5, rtol=1e-5)

    # Case 2: larger batch exercising balanced tiling (300 -> one 304-row
    # tile, ~1% padding instead of 512) with compact D=16 output.
    B2 = 300
    x2 = jax.random.normal(kx2, (B2, HIDDEN), jnp.float32)
    q2 = jax.block_until_ready(qnet_forward(x2, w_t, b2d, dout=DOUT))
    ref2 = x2 @ w.T + b
    assert q2.shape == (B2, DOUT)
    assert jnp.allclose(q2, ref2, atol=1e-5, rtol=1e-5)

    # Case 3: lane-dense padded-output variant (benchmark alternative) still
    # produces identical results after the slice.
    w_t_p, b2d_p = make_qnet_params(w, b, pad_out_to_lanes=True)
    q3 = jax.block_until_ready(
        qnet_forward(x2, w_t_p, b2d_p, dout=DOUT))
    assert q3.shape == (B2, DOUT)
    assert jnp.allclose(q3, ref2, atol=1e-5, rtol=1e-5)

    print("KERNEL_OK")
</pallas_src>

<mosaic_0001>
module attributes {stable_mosaic.version = 11 : i64} {
  func.func @_qnet_kernel(%arg0: i32, %arg1: memref<8x32xf32, #tpu.memory_space<vmem>>, %arg2: memref<32x16xf32, #tpu.memory_space<vmem>>, %arg3: memref<1x16xf32, #tpu.memory_space<vmem>>, %arg4: memref<8x16xf32, #tpu.memory_space<vmem>>) attributes {dimension_semantics = [#tpu.dimension_semantics<parallel>], iteration_bounds = array<i64: 1>, scalar_prefetch = 0 : i64, scratch_operands = 0 : i64, tpu.core_type = #tpu.core_type<tc>, window_params = [{transform_indices = @transform_0, window_bounds = array<i64: 8, 32>}, {pipeline_mode = #tpu.pipeline_mode<synchronous>, transform_indices = @transform_1, window_bounds = array<i64: 32, 16>}, {pipeline_mode = #tpu.pipeline_mode<synchronous>, transform_indices = @transform_2, window_bounds = array<i64: 1, 16>}, {transform_indices = @transform_3, window_bounds = array<i64: 8, 16>}]} {
    %c0 = arith.constant 0 : index
    %c0_0 = arith.constant 0 : index
    %0 = vector.load %arg1[%c0, %c0_0] : memref<8x32xf32, #tpu.memory_space<vmem>>, vector<8x32xf32>
    %c0_1 = arith.constant 0 : index
    %c0_2 = arith.constant 0 : index
    %1 = vector.load %arg2[%c0_1, %c0_2] : memref<32x16xf32, #tpu.memory_space<vmem>>, vector<32x16xf32>
    %cst = arith.constant dense<0.000000e+00> : vector<8x16xf32>
    %2 = tpu.matmul %0, %1, %cst {dimension_numbers = #tpu.dot_dimension_numbers<[1], [0], [0], [1], [0, 0, 1, 1], [], []>} : vector<8x32xf32>, vector<32x16xf32>, vector<8x16xf32> -> vector<8x16xf32>
    %c0_3 = arith.constant 0 : index
    %c0_4 = arith.constant 0 : index
    %3 = vector.load %arg3[%c0_3, %c0_4] : memref<1x16xf32, #tpu.memory_space<vmem>>, vector<1x16xf32>
    %4 = vector.broadcast %3 : vector<1x16xf32> to vector<8x16xf32>
    %5 = arith.addf %2, %4 : vector<8x16xf32>
    %c0_5 = arith.constant 0 : index
    %c0_6 = arith.constant 0 : index
    %6 = vector.load %arg4[%c0_5, %c0_6] : memref<8x16xf32, #tpu.memory_space<vmem>>, vector<8x16xf32>
    tpu.vector_store %arg4[%c0_5, %c0_6], %5 {strides = array<i32>} : memref<8x16xf32, #tpu.memory_space<vmem>>, vector<8x16xf32>,
    return
  }
  func.func @transform_0(%arg0: i32) -> (i32, i32) {
    %c0_i32 = arith.constant 0 : i32
    %c0_i32_0 = arith.constant 0 : i32
    return %arg0, %c0_i32 : i32, i32
  }
  func.func @transform_1(%arg0: i32) -> (i32, i32) {
    %c0_i32 = arith.constant 0 : i32
    %c0_i32_0 = arith.constant 0 : i32
    %c0_i32_1 = arith.constant 0 : i32
    return %c0_i32, %c0_i32_0 : i32, i32
  }
  func.func @transform_2(%arg0: i32) -> (i32, i32) {
    %c0_i32 = arith.constant 0 : i32
    %c0_i32_0 = arith.constant 0 : i32
    %c0_i32_1 = arith.constant 0 : i32
    return %c0_i32, %c0_i32_0 : i32, i32
  }
  func.func @transform_3(%arg0: i32) -> (i32, i32) {
    %c0_i32 = arith.constant 0 : i32
    %c0_i32_0 = arith.constant 0 : i32
    return %arg0, %c0_i32 : i32, i32
  }
}

</mosaic_0001>

<bundles_post_ra>
// kernel: tpu_custom_call.1
= control target key start
LH: loop header
LB: loop body
LE: loop exit
PB: predicated region body
PF: predicated region fallthrough
CT: control target
= control target key end

     0   :  { %v160_v1 = vmov 0.0   ;;  %vm161_vm0 = vmmov 0   ;;  %s204_s0 = inlined_call_operand.vmem [shape: f32[8,32], index: 0, kind: input, shape index: {}]   ;;  %s205_s1 = inlined_call_operand.vmem [shape: f32[32,16], index: 1, kind: input, shape index: {}]   ;;  %s206_s2 = inlined_call_operand.vmem [shape: f32[1,16], index: 2, kind: input, shape index: {}]   ;;  %s207_s3 = inlined_call_operand.hbm [shape: f32[8,16], index: 3, kind: output, shape index: {}]  }
   0x1   :  { %v19_v0 = vld [vmem:[%s205_s1 + $0x18] sm:$0xff]  ;;  %124 = vmatprep.subr.mxu0 %v160_v1  ;;  %v18_v2 = vld [vmem:[%s205_s1 + $0x10] sm:$0xff]  ;;  %132 = vmatprep.mubr.msk.f32.mxu0 %vm161_vm0, %v160_v1 }
   0x2   :  { %125 = vmatpush3.msra.mxu0 %v19_v0 }
   0x3   :  { %8 = vsyncpa [#allocation3], 0  ;;  %126 = vmatprep.subr.mxu0 %v160_v1  ;;  %v17_v3 = vld [vmem:[%s205_s1 + $0x8] sm:$0xff]  ;;  %v16_v4 = vld [vmem:[%s205_s1] sm:$0xff]  ;;  %vm27_vm1 = vcmask 261120   ;;  %s162_s24 = smov [#allocation2]  }
   0x4   :  { %127 = vmatpush3.msra.mxu0 %v18_v2  ;;  %v15_v5 = vld [vmem:[%s204_s0] sm:$0xff]  ;;  %s109_s25 = sshll.u32 %s162_s24, 4  ;;  %vm101_vm2 = vcmask 130048   ;;  %s110_s25 = int_to_ptr.vmem [resolvable:$true] %s109_s25 }
   0x5   :  { %128 = vmatprep.subr.mxu0 %v160_v1  ;;  %v117_v6 = vld [vmem:[%s206_s2] ss:$0 sm:$0xff]  ;;  %s138_s1 = scalar_lea.vmem %s110_s25, 128  ;;  %p143_p1 = scmp.lt.s32.totalorder %s110_s25, %s110_s25 }
   0x6   :  { %129 = vmatpush3.msra.mxu0 %v17_v3  ;;  %p139_p0 = scmp.ne.s32.totalorder %s110_s25, %s138_s1  ;;  %p144_p2 = scmp.lt.s32.totalorder %s138_s1, %s138_s1 }
   0x7   :  { %130 = vmatprep.subr.mxu0 %v160_v1 }
   0x8   :  { %131 = vmatpush3.msra.mxu0 %v16_v4  ;;  %p145_p3 = por %p144_p2, %p143_p1 }
   0x9   :  { %133 = vmatmul.mubr.msk.f32.vlgmr.msra.gmra.mxu0 %vm27_vm1, %v15_v5 }
   0xa   :  { %p146_p4 = pnand %p145_p3, %p139_p0 }
  0xc9   :  { %v97_v7 = vpop.f32.mrf.mxu0 }
  0xca   :  { %v98_v8 = vadd.f32 %v117_v6, %v97_v7 }
  0xcb   :  { %v134_v9 = vpop.f32.mrf.mxu0 }
  0xcc   :  { %102 = vst.msk [vmem:[#allocation2] sm:$0xff] %vm101_vm2, %v98_v8 }
  0xcd   :  { %149 = shalt.err (!%p146_p4)
}
  0xce   :  { %112 = dma.vmem_to_hbm [thread:$0]  %s110_s25, 128, %s207_s3, [#allocation3]  }
  0xcf   :  { %158 = dma.done.wait [#allocation3], 128  }
  0xd0   :  { %159 = vsyncadd [#allocation3], 4294967168 }
  0xd1   :  { %116 = vsyncpa [#allocation3], 1 }

</bundles_post_ra>
